<compile_context>
chip_gen: v6e
topology: v6e:2x2x1
jax: 0.10.0
libtpu: 0.0.40
codegen_flags: <defaults>
</compile_context>

<pallas_src>
import functools

import jax
import jax.numpy as jnp
from jax.experimental import pallas as pl
from jax.experimental.pallas import tpu as pltpu


def _round_up(x: int, m: int) -> int:
    return ((x + m - 1) // m) * m


# --------------------------------------------------------------------------
# Kernel: one MXU matmul tile + broadcast bias add, f32 accumulation.
# --------------------------------------------------------------------------
def _fused_linear_kernel(x_ref, w_ref, b_ref, o_ref):
    o_ref[...] = (
        jnp.dot(
            x_ref[...],
            w_ref[...],
            preferred_element_type=jnp.float32,
            precision=jax.lax.Precision.HIGHEST,
        )
        + b_ref[...]
    )


def _choose_row_tile(T: int, tile_t: int) -> int:
    """Row tile: single block for small T; otherwise aim for an even number of
    >= 2 grid steps (v7x megacore) with steps sized near tile_t rows."""
    if T <= 1024:
        return T
    steps = max(2, pl.cdiv(T, tile_t))
    if steps % 2:
        steps += 1
    return _round_up(pl.cdiv(T, steps), 8)


def _fused_linear_pallas(x, w, b, *, tile_t: int = 4096):
    """x: (T, C) f32, w: (C, P) f32, b: (1, P) f32 -> (T, P) f32."""
    T, C = x.shape
    _, P = w.shape

    t_block = _choose_row_tile(T, tile_t)
    grid = (pl.cdiv(T, t_block),)

    cost = pl.CostEstimate(
        flops=2 * T * C * P,
        transcendentals=0,
        bytes_accessed=4 * (T * C + C * P + P + T * P),
    )

    return pl.pallas_call(
        _fused_linear_kernel,
        out_shape=jax.ShapeDtypeStruct((T, P), jnp.float32),
        grid_spec=pltpu.PrefetchScalarGridSpec(
            num_scalar_prefetch=0,
            grid=grid,
            in_specs=[
                pl.BlockSpec((t_block, C), lambda i: (i, 0)),  # x row tile (pipelined)
                pl.BlockSpec((C, P), lambda i: (0, 0)),        # weights resident
                pl.BlockSpec((1, P), lambda i: (0, 0)),        # bias resident
            ],
            out_specs=pl.BlockSpec((t_block, P), lambda i: (i, 0)),
        ),
        compiler_params=pltpu.CompilerParams(
            # Grid steps are independent row tiles -> megacore-shardable.
            dimension_semantics=("parallel",),
            # At tile_t=4096 the double-buffered working set is a few MiB,
            # far under every generation's default scoped VMEM limit, so
            # vmem_limit_bytes is left at its default.
        ),
        cost_estimate=cost,
    )(x, w, b)


# --------------------------------------------------------------------------
# Parameter preparation: fuse the two projections' columns (one-time cost).
# Interleaved [re, im] order is kept; lane-pad only when it is nearly free.
# --------------------------------------------------------------------------
def fuse_params(weights1, bias1, weights2, bias2):
    C, M1x2 = weights1.shape
    _, M2x2 = weights2.shape
    m1, m2 = M1x2 // 2, M2x2 // 2

    wc = jnp.concatenate([weights1, weights2], axis=1)
    bc = jnp.concatenate([bias1, bias2], axis=1)

    width = 2 * (m1 + m2)
    pad = (-width) % 128
    if pad and pad * 8 <= width:  # <=12.5% extra columns: lane-dense stores win
        wc = jnp.pad(wc, ((0, 0), (0, pad)))
        bc = jnp.pad(bc, ((0, 0), (0, pad)))
    return wc, bc, m1, m2


# --------------------------------------------------------------------------
# Forward: matches torch FreqLinear.forward (returns two complex arrays).
# --------------------------------------------------------------------------
@functools.partial(jax.jit, static_argnames=("modes1", "modes2"))
def freq_linear_forward(x, fused_w, fused_b, modes1, modes2):
    """x: (T, C) f32; fused_w/fused_b from fuse_params.
    Returns (c1, c2) complex64 with shapes (T, modes1), (T, modes2)."""
    h = _fused_linear_pallas(x, fused_w, fused_b)  # (T, P)
    T = x.shape[0]
    h1 = h[:, : 2 * modes1].reshape(T, modes1, 2)
    h2 = h[:, 2 * modes1 : 2 * (modes1 + modes2)].reshape(T, modes2, 2)
    # view_as_complex: the data is already interleaved [re, im].
    c1 = jax.lax.complex(h1[..., 0], h1[..., 1])
    c2 = jax.lax.complex(h2[..., 0], h2[..., 1])
    return c1, c2


# --------------------------------------------------------------------------
# Parameter init mirroring the torch module (interleaved [re, im] columns).
# --------------------------------------------------------------------------
def init_params(key, in_channel, modes1, modes2, bias=True):
    k1, k2 = jax.random.split(key)
    scale1 = 1.0 / (in_channel + 2 * modes1)
    scale2 = 1.0 / (in_channel + 2 * modes2)
    weights1 = scale1 * jax.random.normal(k1, (in_channel, 2 * modes1), jnp.float32)
    weights2 = scale2 * jax.random.normal(k2, (in_channel, 2 * modes2), jnp.float32)
    # bias=False in the torch module means "+ 0"; zeros reproduce that exactly.
    bias1 = jnp.zeros((1, 2 * modes1), jnp.float32)
    bias2 = jnp.zeros((1, 2 * modes2), jnp.float32)
    return weights1, bias1, weights2, bias2


def _reference_forward(x, w1, b1, w2, b2, m1, m2):
    T = x.shape[0]
    h1 = jnp.dot(x, w1, precision=jax.lax.Precision.HIGHEST) + b1
    h2 = jnp.dot(x, w2, precision=jax.lax.Precision.HIGHEST) + b2
    h1 = h1.reshape(T, m1, 2)
    h2 = h2.reshape(T, m2, 2)
    return (
        jax.lax.complex(h1[..., 0], h1[..., 1]),
        jax.lax.complex(h2[..., 0], h2[..., 1]),
    )


if __name__ == "__main__":
    key = jax.random.PRNGKey(0)

    # --- Case 1: small T, narrow width (48 lanes, unpadded), single block. ---
    T, in_channel, modes1, modes2 = 8, 32, 8, 16
    kx, kp, key = jax.random.split(key, 3)
    x = jax.random.normal(kx, (T, in_channel), jnp.float32)
    w1, b1, w2, b2 = init_params(kp, in_channel, modes1, modes2)
    fw, fb, m1, m2 = fuse_params(w1, b1, w2, b2)

    c1, c2 = freq_linear_forward(x, fw, fb, m1, m2)
    c1 = jax.block_until_ready(c1)
    c2 = jax.block_until_ready(c2)
    r1, r2 = _reference_forward(x, w1, b1, w2, b2, m1, m2)
    assert c1.shape == (T, modes1) and c1.dtype == jnp.complex64
    assert c2.shape == (T, modes2) and c2.dtype == jnp.complex64
    assert jnp.allclose(c1, r1, atol=1e-5, rtol=1e-5)
    assert jnp.allclose(c2, r2, atol=1e-5, rtol=1e-5)

    # --- Case 2: larger, non-multiple T -> 2 grid steps + ragged last block. ---
    T_big = 1100
    x_big = jax.random.normal(jax.random.PRNGKey(1), (T_big, in_channel), jnp.float32)
    cb1, cb2 = freq_linear_forward(x_big, fw, fb, m1, m2)
    cb1 = jax.block_until_ready(cb1)
    cb2 = jax.block_until_ready(cb2)
    rb1, rb2 = _reference_forward(x_big, w1, b1, w2, b2, m1, m2)
    assert jnp.allclose(cb1, rb1, atol=1e-5, rtol=1e-5)
    assert jnp.allclose(cb2, rb2, atol=1e-5, rtol=1e-5)

    # --- Case 3: width 126 -> cheap lane pad to 128 (padded-output path). ---
    T3, md1, md2 = 16, 32, 31
    kx3, kp3 = jax.random.split(jax.random.PRNGKey(2))
    x3 = jax.random.normal(kx3, (T3, in_channel), jnp.float32)
    w1c, b1c, w2c, b2c = init_params(kp3, in_channel, md1, md2)
    fw3, fb3, m1c, m2c = fuse_params(w1c, b1c, w2c, b2c)
    c31, c32 = freq_linear_forward(x3, fw3, fb3, m1c, m2c)
    c31 = jax.block_until_ready(c31)
    c32 = jax.block_until_ready(c32)
    r31, r32 = _reference_forward(x3, w1c, b1c, w2c, b2c, md1, md2)
    assert jnp.allclose(c31, r31, atol=1e-5, rtol=1e-5)
    assert jnp.allclose(c32, r32, atol=1e-5, rtol=1e-5)

    print("KERNEL_OK")
</pallas_src>

<mosaic_0001>
module attributes {stable_mosaic.version = 11 : i64} {
  func.func @_fused_linear_kernel(%arg0: i32, %arg1: memref<8x32xf32, #tpu.memory_space<vmem>>, %arg2: memref<32x48xf32, #tpu.memory_space<vmem>>, %arg3: memref<1x48xf32, #tpu.memory_space<vmem>>, %arg4: memref<8x48xf32, #tpu.memory_space<vmem>>) attributes {dimension_semantics = [#tpu.dimension_semantics<parallel>], iteration_bounds = array<i64: 1>, scalar_prefetch = 0 : i64, scratch_operands = 0 : i64, tpu.core_type = #tpu.core_type<tc>, window_params = [{transform_indices = @transform_0, window_bounds = array<i64: 8, 32>}, {pipeline_mode = #tpu.pipeline_mode<synchronous>, transform_indices = @transform_1, window_bounds = array<i64: 32, 48>}, {pipeline_mode = #tpu.pipeline_mode<synchronous>, transform_indices = @transform_2, window_bounds = array<i64: 1, 48>}, {transform_indices = @transform_3, window_bounds = array<i64: 8, 48>}]} {
    %c0 = arith.constant 0 : index
    %c0_0 = arith.constant 0 : index
    %0 = vector.load %arg1[%c0, %c0_0] : memref<8x32xf32, #tpu.memory_space<vmem>>, vector<8x32xf32>
    %c0_1 = arith.constant 0 : index
    %c0_2 = arith.constant 0 : index
    %1 = vector.load %arg2[%c0_1, %c0_2] : memref<32x48xf32, #tpu.memory_space<vmem>>, vector<32x48xf32>
    %cst = arith.constant dense<0.000000e+00> : vector<8x48xf32>
    %2 = tpu.matmul %0, %1, %cst {dimension_numbers = #tpu.dot_dimension_numbers<[1], [0], [0], [1], [0, 0, 1, 1], [], []>, precision = #tpu.contract_precision<fp32>} : vector<8x32xf32>, vector<32x48xf32>, vector<8x48xf32> -> vector<8x48xf32>
    %c0_3 = arith.constant 0 : index
    %c0_4 = arith.constant 0 : index
    %3 = vector.load %arg3[%c0_3, %c0_4] : memref<1x48xf32, #tpu.memory_space<vmem>>, vector<1x48xf32>
    %4 = vector.broadcast %3 : vector<1x48xf32> to vector<8x48xf32>
    %5 = arith.addf %2, %4 : vector<8x48xf32>
    %c0_5 = arith.constant 0 : index
    %c0_6 = arith.constant 0 : index
    %6 = vector.load %arg4[%c0_5, %c0_6] : memref<8x48xf32, #tpu.memory_space<vmem>>, vector<8x48xf32>
    tpu.vector_store %arg4[%c0_5, %c0_6], %5 {strides = array<i32>} : memref<8x48xf32, #tpu.memory_space<vmem>>, vector<8x48xf32>,
    return
  }
  func.func @transform_0(%arg0: i32) -> (i32, i32) {
    %c0_i32 = arith.constant 0 : i32
    %c0_i32_0 = arith.constant 0 : i32
    return %arg0, %c0_i32 : i32, i32
  }
  func.func @transform_1(%arg0: i32) -> (i32, i32) {
    %c0_i32 = arith.constant 0 : i32
    %c0_i32_0 = arith.constant 0 : i32
    %c0_i32_1 = arith.constant 0 : i32
    return %c0_i32, %c0_i32_0 : i32, i32
  }
  func.func @transform_2(%arg0: i32) -> (i32, i32) {
    %c0_i32 = arith.constant 0 : i32
    %c0_i32_0 = arith.constant 0 : i32
    %c0_i32_1 = arith.constant 0 : i32
    return %c0_i32, %c0_i32_0 : i32, i32
  }
  func.func @transform_3(%arg0: i32) -> (i32, i32) {
    %c0_i32 = arith.constant 0 : i32
    %c0_i32_0 = arith.constant 0 : i32
    return %arg0, %c0_i32 : i32, i32
  }
}

</mosaic_0001>

<bundles_post_ra>
// kernel: custom-call.1
= control target key start
LH: loop header
LB: loop body
LE: loop exit
PB: predicated region body
PF: predicated region fallthrough
CT: control target
= control target key end

     0   :  { %s92_s0 = inlined_call_operand.vmem [shape: f32[8,16], index: 0, kind: input, shape index: {}]   ;;  %s93_s1 = inlined_call_operand.vmem [shape: f32[8,16], index: 1, kind: input, shape index: {}]   ;;  %s94_s2 = inlined_call_operand.hbm [shape: c64[8,16], index: 2, kind: output, shape index: {}]  }
   0x1   :  { %s3_s11 = scalar_lea.hbm %s94_s2, 128 }
   0x2   :  { %4 = vsyncpa [#allocation0], 0  ;;  %s5_s14 = sshll.u32 %s92_s0, 4  ;;  %s6_s14 = int_to_ptr.vmem [resolvable:$true] %s5_s14 }
   0x3   :  { %s18_s15 = scalar_lea.vmem %s6_s14, 128  ;;  %p23_p1 = scmp.lt.s32.totalorder %s6_s14, %s6_s14 }
   0x4   :  { %p19_p0 = scmp.ne.s32.totalorder %s6_s14, %s18_s15  ;;  %p24_p2 = scmp.lt.s32.totalorder %s18_s15, %s18_s15 }
   0x6   :  { %p25_p3 = por %p24_p2, %p23_p1 }
   0x8   :  { %p26_p4 = pnand %p25_p3, %p19_p0 }
   0xa   :  { %29 = shalt.err (!%p26_p4)  }
   0xb   :  { %8 = dma.vmem_to_hbm [thread:$0]  %s6_s14, 128, %s94_s2, [#allocation0] }
   0xc   :  { %61 = dma.done.wait [#allocation0], 128  }
   0xd   :  { %62 = vsyncadd [#allocation0], 4294967168 }
   0xe   :  { %10 = vsyncpa [#allocation0], 1 }
   0xf   :  { %11 = vsyncpa [#allocation1], 0  ;;  %s12_s0 = sshll.u32 %s93_s1, 4  ;;  %s13_s0 = int_to_ptr.vmem [resolvable:$true] %s12_s0 }
  0x10   :  { %s38_s20 = scalar_lea.vmem %s13_s0, 128  ;;  %p43_p6 = scmp.lt.s32.totalorder %s13_s0, %s13_s0 }
  0x11   :  { %p39_p5 = scmp.ne.s32.totalorder %s13_s0, %s38_s20  ;;  %p44_p7 = scmp.lt.s32.totalorder %s38_s20, %s38_s20 }
  0x13   :  { %p45_p8 = por %p44_p7, %p43_p6 }
  0x15   :  { %p46_p9 = pnand %p45_p8, %p39_p5 }
  0x17   :  { %49 = shalt.err (!%p46_p9)  }
  0x18   :  { %15 = dma.vmem_to_hbm [thread:$0]  %s13_s0, 128, %s3_s11, [#allocation1] }
  0x19   :  { %63 = dma.done.wait [#allocation1], 128  }
  0x1a   :  { %64 = vsyncadd [#allocation1], 4294967168 }
  0x1b   :  { %17 = vsyncpa [#allocation1], 1 }

// kernel: custom-call
= control target key start
LH: loop header
LB: loop body
LE: loop exit
PB: predicated region body
PF: predicated region fallthrough
CT: control target
= control target key end

     0   :  { %s92_s0 = inlined_call_operand.vmem [shape: f32[8,8], index: 0, kind: input, shape index: {}]   ;;  %s93_s1 = inlined_call_operand.vmem [shape: f32[8,8], index: 1, kind: input, shape index: {}]   ;;  %s94_s2 = inlined_call_operand.hbm [shape: c64[8,8], index: 2, kind: output, shape index: {}]  }
   0x1   :  { %s3_s11 = scalar_lea.hbm %s94_s2, 128 }
   0x2   :  { %4 = vsyncpa [#allocation0], 0  ;;  %s5_s14 = sshll.u32 %s92_s0, 4  ;;  %s6_s14 = int_to_ptr.vmem [resolvable:$true] %s5_s14 }
   0x3   :  { %s18_s15 = scalar_lea.vmem %s6_s14, 128  ;;  %p23_p1 = scmp.lt.s32.totalorder %s6_s14, %s6_s14 }
   0x4   :  { %p19_p0 = scmp.ne.s32.totalorder %s6_s14, %s18_s15  ;;  %p24_p2 = scmp.lt.s32.totalorder %s18_s15, %s18_s15 }
   0x6   :  { %p25_p3 = por %p24_p2, %p23_p1 }
   0x8   :  { %p26_p4 = pnand %p25_p3, %p19_p0 }
   0xa   :  { %29 = shalt.err (!%p26_p4)  }
   0xb   :  { %8 = dma.vmem_to_hbm [thread:$0]  %s6_s14, 128, %s94_s2, [#allocation0] }
   0xc   :  { %61 = dma.done.wait [#allocation0], 128  }
   0xd   :  { %62 = vsyncadd [#allocation0], 4294967168 }
   0xe   :  { %10 = vsyncpa [#allocation0], 1 }
   0xf   :  { %11 = vsyncpa [#allocation1], 0  ;;  %s12_s0 = sshll.u32 %s93_s1, 4  ;;  %s13_s0 = int_to_ptr.vmem [resolvable:$true] %s12_s0 }
  0x10   :  { %s38_s20 = scalar_lea.vmem %s13_s0, 128  ;;  %p43_p6 = scmp.lt.s32.totalorder %s13_s0, %s13_s0 }
  0x11   :  { %p39_p5 = scmp.ne.s32.totalorder %s13_s0, %s38_s20  ;;  %p44_p7 = scmp.lt.s32.totalorder %s38_s20, %s38_s20 }
  0x13   :  { %p45_p8 = por %p44_p7, %p43_p6 }
  0x15   :  { %p46_p9 = pnand %p45_p8, %p39_p5 }
  0x17   :  { %49 = shalt.err (!%p46_p9)  }
  0x18   :  { %15 = dma.vmem_to_hbm [thread:$0]  %s13_s0, 128, %s3_s11, [#allocation1] }
  0x19   :  { %63 = dma.done.wait [#allocation1], 128  }
  0x1a   :  { %64 = vsyncadd [#allocation1], 4294967168 }
  0x1b   :  { %17 = vsyncpa [#allocation1], 1 }

// kernel: freq_linear_forward.1
= control target key start
LH: loop header
LB: loop body
LE: loop exit
PB: predicated region body
PF: predicated region fallthrough
CT: control target
= control target key end

     0   :  { %8 = vsyncpa [#allocation3], 0  ;;  %s800_s0 = inlined_call_operand.hbm [shape: f32[8,32], index: 0, kind: input, shape index: {}]   ;;  %s801_s1 = inlined_call_operand.hbm [shape: f32[32,48], index: 1, kind: input, shape index: {}]   ;;  %s802_s2 = inlined_call_operand.vmem [shape: f32[1,48], index: 2, kind: input, shape index: {}]   ;;  %s803_s3 = inlined_call_operand.vmem [shape: f32[8,48], index: 3, kind: output, shape index: {}]  }
   0x1   :  { %9 = vsyncpa [#allocation5], 0  ;;  %s696_s12 = smov [#allocation2]   ;;  %s697_s14 = smov [#allocation4]  }
   0x2   :  { %s16_s13 = sshll.u32 %s696_s12, 4  ;;  %s25_s15 = sshll.u32 %s697_s14, 4  ;;  %s17_s13 = int_to_ptr.vmem [resolvable:$true] %s16_s13  ;;  %s26_s15 = int_to_ptr.vmem [resolvable:$true] %s25_s15 }
   0x3   :  { %s660_s16 = scalar_lea.vmem %s17_s13, 128  ;;  %p665_p1 = scmp.lt.s32.totalorder %s17_s13, %s17_s13 }
   0x4   :  { %p661_p0 = scmp.ne.s32.totalorder %s17_s13, %s660_s16  ;;  %p666_p2 = scmp.lt.s32.totalorder %s660_s16, %s660_s16 }
   0x6   :  { %p667_p3 = por %p666_p2, %p665_p1 }
   0x8   :  { %p668_p4 = pnand %p667_p3, %p661_p0 }
   0xa   :  { %671 = shalt.err (!%p668_p4)
}
   0xb   :  { %19 = dma.hbm_to_vmem [thread:$0]  %s800_s0, 128, %s17_s13, [#allocation3]  }
   0xc   :  { %s680_s19 = scalar_lea.vmem %s26_s15, 512  ;;  %p685_p6 = scmp.lt.s32.totalorder %s26_s15, %s26_s15 }
   0xd   :  { %p681_p5 = scmp.ne.s32.totalorder %s26_s15, %s680_s19  ;;  %p686_p7 = scmp.lt.s32.totalorder %s680_s19, %s680_s19 }
   0xf   :  { %p687_p8 = por %p686_p7, %p685_p6 }
  0x11   :  { %p688_p9 = pnand %p687_p8, %p681_p5 }
  0x13   :  { %691 = shalt.err (!%p688_p9)
}
  0x14   :  { %s698_s20 = smov 128   ;;  %s699_s21 = smov 8  }
  0x15   :  { %31 = dma.hbm_to_vmem [thread:$0]  %s801_s1, 512, %s26_s15, [#allocation5], %s698_s20, %s698_s20, %s699_s21  }
  0x16   :  { %692 = dma.done.wait [#allocation3], 128  }
  0x17   :  { %693 = vsyncadd [#allocation3], 4294967168 }
  0x18   :  { %694 = dma.done.wait [#allocation5], 512  }
  0x19   :  { %695 = vsyncadd [#allocation5], 4294966784  ;;  %v700_v0 = vmov 0.0   ;;  %vm701_vm0 = vmmov 0   ;;  %vm52_vm1 = vcmask 261120   ;;  %v44_v1 = vld [vmem:[#allocation4 + $0x18] sm:$0xff] }
  0x1a   :  { %580 = vmatprep.subr.mxu0 %v700_v0  ;;  %591 = vmatprep.subr.mxu1 %v700_v0  ;;  %v43_v2 = vld [vmem:[#allocation4 + $0x10] sm:$0xff]  ;;  %v42_v3 = vld [vmem:[#allocation4 + $0x8] sm:$0xff]  ;;  %v734_v4 = vand.u32 4294901760, %v44_v1  ;;  %v41_v7 = vld [vmem:[#allocation4] sm:$0xff]  ;;  %vm541_vm2 = vcmask 392192  }
  0x1b   :  { %588 = vmatprep.mubr.msk.f32.mxu0 %vm701_vm0, %v700_v0  ;;  %599 = vmatprep.mubr.msk.f32.mxu1 %vm701_vm0, %v700_v0  ;;  %v736_v5 = vand.u32 4294901760, %v43_v2  ;;  %v738_v6 = vand.u32 4294901760, %v42_v3  ;;  %v40_v8 = vld [vmem:[#allocation2] sm:$0xff]  ;;  %v740_v9 = vand.u32 4294901760, %v41_v7 }
  0x1c   :  { %v54_v10 = vsel %vm52_vm1, %v40_v8, 0  ;;  %581 = vmatpush3.msra.mxu0 %v734_v4  ;;  %v161_v11 = vsub.f32 %v44_v1, %v734_v4  ;;  %v549_v35 = vld [vmem:[%s802_s2] ss:$0 sm:$0xff] }
  0x1d   :  { %v744_v12 = vand.u32 4294901760, %v54_v10  ;;  %v168_v13 = vsub.f32 %v43_v2, %v736_v5  ;;  %v175_v14 = vsub.f32 %v42_v3, %v738_v6  ;;  %582 = vmatprep.subr.mxu0 %v700_v0  ;;  %v182_v15 = vsub.f32 %v41_v7, %v740_v9 }
  0x1e   :  { %583 = vmatpush3.msra.mxu0 %v736_v5  ;;  %v162_v16 = vand.u32 4294901760, %v161_v11 }
  0x1f   :  { %v126_v17 = vsub.f32 %v54_v10, %v744_v12  ;;  %v169_v18 = vand.u32 4294901760, %v168_v13  ;;  %v176_v19 = vand.u32 4294901760, %v175_v14  ;;  %584 = vmatprep.subr.mxu0 %v700_v0  ;;  %v183_v20 = vand.u32 4294901760, %v182_v15 }
  0x20   :  { %585 = vmatpush3.msra.mxu0 %v738_v6  ;;  %v163_v21 = vsub.f32 %v161_v11, %v162_v16 }
  0x21   :  { %v127_v22 = vand.u32 4294901760, %v126_v17  ;;  %v170_v23 = vsub.f32 %v168_v13, %v169_v18  ;;  %v177_v24 = vsub.f32 %v175_v14, %v176_v19  ;;  %586 = vmatprep.subr.mxu0 %v700_v0  ;;  %v184_v28 = vsub.f32 %v182_v15, %v183_v20 }
  0x22   :  { %587 = vmatpush3.msra.mxu0 %v740_v9  ;;  %v164_v25 = vand.u32 4294901760, %v163_v21 }
  0x23   :  { %v128_v26 = vsub.f32 %v126_v17, %v127_v22  ;;  %v171_v27 = vand.u32 4294901760, %v170_v23  ;;  %602 = vmatprep.subr.mxu0 %v700_v0  ;;  %v178_v30 = vand.u32 4294901760, %v177_v24  ;;  %v185_v31 = vand.u32 4294901760, %v184_v28 }
  0x24   :  { %592 = vmatpush3.msra.mxu1 %v164_v25 }
  0x25   :  { %v129_v29 = vand.u32 4294901760, %v128_v26  ;;  %593 = vmatprep.subr.mxu1 %v700_v0 }
  0x26   :  { %594 = vmatpush3.msra.mxu1 %v171_v27 }
  0x27   :  { %589 = vmatmul.mubr.f32.vlgmr.msra.gmra.mxu0 %v129_v29  ;;  %595 = vmatprep.subr.mxu1 %v700_v0 }
  0x28   :  { %603 = vmatpush3.msra.mxu0 %v161_v11  ;;  %596 = vmatpush3.msra.mxu1 %v178_v30 }
  0x29   :  { %604 = vmatprep.subr.mxu0 %v700_v0  ;;  %597 = vmatprep.subr.mxu1 %v700_v0 }
  0x2a   :  { %605 = vmatpush3.msra.mxu0 %v168_v13  ;;  %598 = vmatpush3.msra.mxu1 %v185_v31 }
  0x2b   :  { %606 = vmatprep.subr.mxu0 %v700_v0  ;;  %600 = vmatmul.mubr.f32.vlgmr.msra.gmra.mxu1 %v744_v12 }
  0x2c   :  { %607 = vmatpush3.msra.mxu0 %v175_v14  ;;  %613 = vmatprep.subr.mxu1 %v700_v0 }
  0x2d   :  { %608 = vmatprep.subr.mxu0 %v700_v0  ;;  %614 = vmatpush3.msra.mxu1 %v734_v4 }
  0x2e   :  { %609 = vmatpush3.msra.mxu0 %v182_v15  ;;  %610 = vmatprep.mubr.msk.f32.mxu0 %vm701_vm0, %v700_v0 }
  0x2f   :  { %615 = vmatprep.subr.mxu1 %v700_v0  ;;  %624 = vmatprep.subr.mxu0 %v700_v0 }
  0x30   :  { %611 = vmatmul.mubr.f32.vlgmr.msra.gmra.mxu0 %v126_v17  ;;  %616 = vmatpush3.msra.mxu1 %v736_v5 }
  0x31   :  { %625 = vmatpush3.msra.mxu0 %v162_v16  ;;  %617 = vmatprep.subr.mxu1 %v700_v0 }
  0x32   :  { %626 = vmatprep.subr.mxu0 %v700_v0  ;;  %618 = vmatpush3.msra.mxu1 %v738_v6 }
  0x33   :  { %627 = vmatpush3.msra.mxu0 %v169_v18  ;;  %619 = vmatprep.subr.mxu1 %v700_v0 }
  0x34   :  { %628 = vmatprep.subr.mxu0 %v700_v0  ;;  %620 = vmatpush3.msra.mxu1 %v740_v9 }
  0x35   :  { %621 = vmatprep.mubr.msk.f32.mxu1 %vm701_vm0, %v700_v0  ;;  %629 = vmatpush3.msra.mxu0 %v176_v19 }
  0x36   :  { %622 = vmatmul.mubr.f32.vlgmr.msra.gmra.mxu1 %v127_v22  ;;  %630 = vmatprep.subr.mxu0 %v700_v0 }
  0x37   :  { %635 = vmatprep.subr.mxu1 %v700_v0  ;;  %631 = vmatpush3.msra.mxu0 %v183_v20 }
  0x38   :  { %632 = vmatprep.mubr.msk.f32.mxu0 %vm701_vm0, %v700_v0  ;;  %636 = vmatpush3.msra.mxu1 %v734_v4 }
  0x39   :  { %633 = vmatmul.mubr.f32.vlgmr.msra.gmra.mxu0 %v744_v12  ;;  %637 = vmatprep.subr.mxu1 %v700_v0 }
  0x3a   :  { %643 = vmatprep.mubr.msk.f32.mxu1 %vm701_vm0, %v700_v0  ;;  %638 = vmatpush3.msra.mxu1 %v736_v5 }
  0x3b   :  { %639 = vmatprep.subr.mxu1 %v700_v0 }
  0x3c   :  { %640 = vmatpush3.msra.mxu1 %v738_v6 }
  0x3d   :  { %641 = vmatprep.subr.mxu1 %v700_v0 }
  0x3e   :  { %642 = vmatpush3.msra.mxu1 %v740_v9 }
  0x3f   :  { %644 = vmatmul.mubr.f32.vlgmr.msra.gmra.mxu1 %v744_v12 }
  0xe7   :  { %v131_v32 = vpop.f32.mrf.mxu0 }
  0xe8   :  { %v132_v38 = vadd.f32 %v549_v35, %v131_v32 }
  0xe9   :  { %v590_v33 = vpop.f32.mrf.mxu0 }
  0xeb   :  { %v222_v34 = vpop.f32.mrf.mxu1 }
  0xec   :  { %v223_v40 = vadd.f32 %v222_v34, %v132_v38 }
  0xed   :  { %v601_v36 = vpop.f32.mrf.mxu1 }
  0xf0   :  { %v302_v37 = vpop.f32.mrf.mxu0 }
  0xf1   :  { %v303_v43 = vadd.f32 %v302_v37, %v223_v40 }
  0xf2   :  { %v612_v39 = vpop.f32.mrf.mxu0 }
  0xf6   :  { %v379_v41 = vpop.f32.mrf.mxu1 }
  0xf7   :  { %v380_v45 = vadd.f32 %v379_v41, %v303_v43 }
  0xf8   :  { %v623_v42 = vpop.f32.mrf.mxu1 }
  0xf9   :  { %v462_v44 = vpop.f32.mrf.mxu0 }
  0xfa   :  { %v463_v47 = vadd.f32 %v462_v44, %v380_v45 }
  0xfb   :  { %v634_v46 = vpop.f32.mrf.mxu0 }
  0xff   :  { %v537_v48 = vpop.f32.mrf.mxu1 }
 0x100   :  { %v538_v49 = vadd.f32 %v537_v48, %v463_v47 }
 0x101   :  { %v645_v50 = vpop.f32.mrf.mxu1 }
 0x102   :  { %542 = vst.msk [vmem:[%s803_s3] sm:$0xff] %vm541_vm2, %v538_v49 }
 0x103   :  { %547 = vsyncpa [#allocation3], 1 }
 0x104   :  { %548 = vsyncpa [#allocation5], 1 }

</bundles_post_ra>
